<compile_context>
chip_gen: v7x
topology: tpu7x:2x2x1
jax: 0.10.0
libtpu: 0.0.40
codegen_flags: <defaults>
</compile_context>

<pallas_src>
import functools

import jax
import jax.numpy as jnp
from jax.experimental import pallas as pl
from jax.experimental.pallas import tpu as pltpu


def _flatten_kernel(x_ref, o_ref):
    # Pure tile copy; each grid step moves one (tile_n, tile_d) block.
    o_ref[...] = x_ref[...]


def _block_tuning():
    """(target_block_bytes, vmem_limit_bytes or None) per TPU generation."""
    try:
        kind = jax.devices()[0].device_kind.lower()
    except Exception:  # pragma: no cover - defensive
        kind = ""
    if "v6" in kind:                                   # v6e / Trillium
        # 4 live buffers * 6 MiB = 24 MiB < 32 MiB default scoped VMEM.
        return 6 << 20, None
    if "v7" in kind or "tpu7" in kind or "7x" in kind:  # v7x
        # 4 * 8 MiB = 32 MiB would exactly hit the default; raise to 48 MiB,
        # still well under the 64 MiB physical VMEM.
        return 8 << 20, 48 << 20
    if "v5 lite" in kind or "v5e" in kind:              # v5e
        # 4 * 3 MiB = 12 MiB < 16 MiB default scoped VMEM.
        return 3 << 20, None
    # Unknown / older generations: conservative, fits any 16 MiB default.
    return 3 << 20, None


def _aligned_tile(dim: int, align: int, cap_elems: int) -> int:
    """Largest multiple of `align` <= min(cap_elems, dim); full extent if
    `dim` <= `align`.  Non-dividing tiles are fine: pl.cdiv grids produce
    masked partial edge blocks."""
    if dim <= align:
        return dim
    cap = min(cap_elems, dim)
    tile = (cap // align) * align
    return max(tile, align)


@functools.partial(jax.jit, static_argnames=("min_pallas_bytes",))
def flatten(x: jax.Array, *, min_pallas_bytes: int = 1 << 20) -> jax.Array:
    """Equivalent of torch `x.view(x.size(0), -1)` for an (N, ...) input."""
    n = x.shape[0]
    d = 1
    for s in x.shape[1:]:
        d *= s

    itemsize = jnp.dtype(x.dtype).itemsize
    total_bytes = n * d * itemsize

    # Metadata-only row-major flatten (== torch .view on contiguous input).
    x2d = jnp.reshape(x, (n, d))

    # Fast path: kernel launch + DMA setup dominate for tiny inputs.
    if total_bytes < min_pallas_bytes:
        return x2d

    target_bytes, vmem_limit = _block_tuning()

    # Sublane pack factor: 8 for f32, 16 for bf16, 32 for int8/fp8.
    sublane = max(8, 32 // itemsize)

    # Lane tile: as wide as possible (lane-dense output -> unmasked stores),
    # 128-aligned, capped so a block with the minimum sublane count fits the
    # per-generation byte budget.
    max_lanes = max(128, target_bytes // (itemsize * sublane))
    tile_d = _aligned_tile(d, 128, max_lanes)

    # Row tile: sublane-aligned, sized so tile_n * tile_d * itemsize ~= budget.
    max_rows = max(sublane, target_bytes // (itemsize * tile_d))
    tile_n = _aligned_tile(n, sublane, max_rows)

    grid_n = pl.cdiv(n, tile_n)
    grid_d = pl.cdiv(d, tile_d)

    # Put the larger axis first so megacore (v7x) shards the bigger dimension.
    if grid_d >= grid_n:
        grid = (grid_d, grid_n)
        index_map = lambda j, i: (i, j)
    else:
        grid = (grid_n, grid_d)
        index_map = lambda i, j: (i, j)

    cp_kwargs = dict(
        # Pure copy, no reduction axis -> both axes parallel (megacore).
        dimension_semantics=("parallel", "parallel"),
        # Allow XLA to fuse the reshape/relayout producer into the kernel's
        # input DMA instead of materializing it in HBM first.
        allow_input_fusion=[True],
    )
    if vmem_limit is not None:
        cp_kwargs["vmem_limit_bytes"] = vmem_limit

    return pl.pallas_call(
        _flatten_kernel,
        out_shape=jax.ShapeDtypeStruct((n, d), x.dtype),
        grid_spec=pltpu.PrefetchScalarGridSpec(
            num_scalar_prefetch=0,
            grid=grid,
            in_specs=[pl.BlockSpec((tile_n, tile_d), index_map)],
            out_specs=pl.BlockSpec((tile_n, tile_d), index_map),
        ),
        compiler_params=pltpu.CompilerParams(**cp_kwargs),
    )(x2d)


if __name__ == "__main__":
    key = jax.random.PRNGKey(0)
    # Small NCHW input consistent with the module's forward.
    x = jax.random.normal(key, (2, 4, 16, 16), dtype=jnp.float32)
    ref = jnp.reshape(x, (x.shape[0], -1))

    # Force the Pallas path even for this tiny input so the kernel runs.
    out = jax.block_until_ready(flatten(x, min_pallas_bytes=0))
    assert out.shape == (2, 4 * 16 * 16), out.shape
    assert out.dtype == x.dtype
    assert bool(jnp.array_equal(out, ref))

    # Unaligned shape: N not a multiple of 8, D not a multiple of 128 —
    # exercises the masked partial-edge-block path.
    x2 = jax.random.normal(jax.random.PRNGKey(0), (3, 5, 7, 9), dtype=jnp.float32)
    out2 = jax.block_until_ready(flatten(x2, min_pallas_bytes=0))
    assert bool(jnp.array_equal(out2, jnp.reshape(x2, (3, -1))))

    # Default behavior: tiny input takes the metadata-only fast path.
    out3 = jax.block_until_ready(flatten(x))
    assert bool(jnp.array_equal(out3, ref))

    print("KERNEL_OK")
</pallas_src>

<mosaic_0001>
module attributes {stable_mosaic.version = 11 : i64} {
  func.func @_flatten_kernel(%arg0: i32, %arg1: i32, %arg2: memref<2x1024xf32, #tpu.memory_space<vmem>>, %arg3: memref<2x1024xf32, #tpu.memory_space<vmem>>) attributes {dimension_semantics = [#tpu.dimension_semantics<parallel>, #tpu.dimension_semantics<parallel>], iteration_bounds = array<i64: 1, 1>, scalar_prefetch = 0 : i64, scratch_operands = 0 : i64, tpu.core_type = #tpu.core_type<tc>, window_params = [{transform_indices = @transform_0, window_bounds = array<i64: 2, 1024>}, {transform_indices = @transform_1, window_bounds = array<i64: 2, 1024>}]} {
    %c0 = arith.constant 0 : index
    %c0_0 = arith.constant 0 : index
    %0 = vector.load %arg2[%c0, %c0_0] : memref<2x1024xf32, #tpu.memory_space<vmem>>, vector<2x1024xf32>
    %c0_1 = arith.constant 0 : index
    %c0_2 = arith.constant 0 : index
    %1 = vector.load %arg3[%c0_1, %c0_2] : memref<2x1024xf32, #tpu.memory_space<vmem>>, vector<2x1024xf32>
    tpu.vector_store %arg3[%c0_1, %c0_2], %0 {strides = array<i32>} : memref<2x1024xf32, #tpu.memory_space<vmem>>, vector<2x1024xf32>,
    return
  }
  func.func @transform_0(%arg0: i32, %arg1: i32) -> (i32, i32) {
    %c0_i32 = arith.constant 0 : i32
    return %arg1, %arg0 : i32, i32
  }
  func.func @transform_1(%arg0: i32, %arg1: i32) -> (i32, i32) {
    %c0_i32 = arith.constant 0 : i32
    return %arg1, %arg0 : i32, i32
  }
}

</mosaic_0001>

<bundles_post_ra>
// kernel: flatten.1
= control target key start
LH: loop header
LB: loop body
LE: loop exit
PB: predicated region body
PF: predicated region fallthrough
CT: control target
= control target key end

     0   :  { %s81_s0 = inlined_call_operand.vmem [shape: f32[2,1024], index: 0, kind: input, shape index: {}]   ;;  %s82_s1 = inlined_call_operand.hbm [shape: f32[2,1024], index: 1, kind: output, shape index: {}]  }
   0x1   :  { %v9_v0 = vld [vmem:[%s81_s0] sm:$0xff]  ;;  %v10_v1 = vld [vmem:[%s81_s0 + $0x8] sm:$0xff] }
   0x2   :  { %6 = vsyncpa [#allocation3], 0  ;;  %11 = vst [vmem:[#allocation2] sm:$0xff] %v9_v0  ;;  %s52_s10 = smov [#allocation2]  }
   0x3   :  { %12 = vst [vmem:[#allocation2 + $0x8] sm:$0xff] %v10_v1  ;;  %s19_s11 = sshll.u32 %s52_s10, 4  ;;  %s20_s11 = int_to_ptr.vmem [resolvable:$true] %s19_s11 }
   0x4   :  { %s28_s12 = scalar_lea.vmem %s20_s11, 256  ;;  %p33_p1 = scmp.lt.s32.totalorder %s20_s11, %s20_s11 }
   0x5   :  { %p29_p0 = scmp.ne.s32.totalorder %s20_s11, %s28_s12  ;;  %p34_p2 = scmp.lt.s32.totalorder %s28_s12, %s28_s12 }
   0x7   :  { %p35_p3 = por %p34_p2, %p33_p1 }
   0x9   :  { %p36_p4 = pnand %p35_p3, %p29_p0 }
   0xb   :  { %39 = shalt.err (!%p36_p4)
}
   0xc   :  { %s40_s15 = scalar_lea.hbm %s82_s1, 256 }
   0xd   :  { %p41_p5 = scmp.ne.s32.totalorder %s82_s1, %s40_s15  ;;  %p44_p6 = scmp.lt.u32.totalorder %s40_s15, %s82_s1 }
   0xf   :  { %p46_p7 = pnand %p44_p6, %p41_p5 }
  0x11   :  { %49 = shalt.err (!%p46_p7)
}
  0x12   :  { %22 = dma.vmem_to_hbm [thread:$0]  %s20_s11, 256, %s82_s1, [#allocation3]  }
  0x13   :  { %50 = dma.done.wait [#allocation3], 256  }
  0x14   :  { %51 = vsyncadd [#allocation3], 4294967040 }
  0x15   :  { %26 = vsyncpa [#allocation3], 1 }

</bundles_post_ra>
